<compile_context>
chip_gen: v7x
topology: tpu7x:2x2x1
jax: 0.10.0
libtpu: 0.0.40
codegen_flags: <defaults>
</compile_context>

<pallas_src>
import math

import jax
import jax.numpy as jnp
from jax.experimental import pallas as pl
from jax.experimental.pallas import tpu as pltpu

SUB_REP_DIM = 3
NODE_FEATURES = 42
OUT_DIM = 1
H_EMBED = 64   # MLP_embed hidden
D_GCN = 32     # GCN feature width / MLP_embed output
H_PRED = 32    # MLP_pred hidden

PAD = 128          # lane width everything is padded to
# packed-parameter row layout (all 128-row / 8-row aligned slots)
ROW_W1 = 0         # [k_in, H_EMBED]   (k_in = NODE_FEATURES + num_subreddits)
ROW_W2 = 128       # [H_EMBED, D_GCN]
ROW_WG1 = 256      # [D_GCN, D_GCN]
ROW_WG2 = 384      # [D_GCN, D_GCN]
ROW_WP1 = 512      # [D_GCN, H_PRED]
ROW_WP2 = 640      # [H_PRED, OUT_DIM]
ROW_B1 = 768
ROW_B2 = 776
ROW_BG1 = 784
ROW_BG2 = 792
ROW_BP1 = 800
ROW_BP2 = 808
P_ROWS = 816


# --------------------------------------------------------------------------- #
# kernels
# --------------------------------------------------------------------------- #
def _embed_kernel(x_ref, p_ref, out_ref):
    """MLP_embed (with folded subreddit aggregation) + GCN1 projection."""
    f32 = jnp.float32
    w1 = p_ref[ROW_W1:ROW_W1 + PAD, :]
    w2 = p_ref[ROW_W2:ROW_W2 + PAD, :]
    wg1 = p_ref[ROW_WG1:ROW_WG1 + PAD, :]
    b1 = p_ref[ROW_B1:ROW_B1 + 1, :]
    b2 = p_ref[ROW_B2:ROW_B2 + 1, :]

    h = jnp.tanh(jnp.dot(x_ref[...], w1, preferred_element_type=f32) + b1)
    h = jnp.tanh(jnp.dot(h, w2, preferred_element_type=f32) + b2)
    # TODO(synk): F.dropout(p=0.5) modeled in eval mode (identity); stochastic
    # training-mode dropout omitted.
    p0 = jnp.dot(h, wg1, preferred_element_type=f32)       # h @ Wg1
    out_ref[...] = p0.astype(out_ref.dtype)


def _gcn1_kernel(a_ref, p0_ref, p_ref, out_ref, acc_ref):
    """K-tiled GCN1 aggregation (A @ (h@Wg1) + bg1, relu) + GCN2 projection."""
    f32 = jnp.float32
    k = pl.program_id(1)

    @pl.when(k == 0)
    def _():
        acc_ref[...] = jnp.zeros_like(acc_ref)

    acc_ref[...] += jnp.dot(a_ref[...], p0_ref[...], preferred_element_type=f32)

    @pl.when(k == pl.num_programs(1) - 1)
    def _():
        wg2 = p_ref[ROW_WG2:ROW_WG2 + PAD, :]
        bg1 = p_ref[ROW_BG1:ROW_BG1 + 1, :]
        z = jnp.maximum(acc_ref[...] + bg1, 0.0)
        out_ref[...] = jnp.dot(z, wg2,
                               preferred_element_type=f32).astype(out_ref.dtype)


def _gcn2_pred_kernel(a_ref, p1_ref, priors_ref, p_ref, out_ref, acc_ref):
    """K-tiled GCN2 aggregation + relu + MLP_pred + skip-add of priors."""
    f32 = jnp.float32
    k = pl.program_id(1)

    @pl.when(k == 0)
    def _():
        acc_ref[...] = jnp.zeros_like(acc_ref)

    acc_ref[...] += jnp.dot(a_ref[...], p1_ref[...], preferred_element_type=f32)

    @pl.when(k == pl.num_programs(1) - 1)
    def _():
        wp1 = p_ref[ROW_WP1:ROW_WP1 + PAD, :]
        wp2 = p_ref[ROW_WP2:ROW_WP2 + PAD, :]
        bg2 = p_ref[ROW_BG2:ROW_BG2 + 1, :]
        bp1 = p_ref[ROW_BP1:ROW_BP1 + 1, :]
        bp2 = p_ref[ROW_BP2:ROW_BP2 + 1, :]

        z = jnp.maximum(acc_ref[...] + bg2, 0.0)
        h = jnp.tanh(jnp.dot(z, wp1, preferred_element_type=f32) + bp1)
        out = jnp.tanh(jnp.dot(h, wp2, preferred_element_type=f32) + bp2)
        # lane-dense [row_tile, 128] store; only lane 0 meaningful (wrapper slices)
        out_ref[...] = out + priors_ref[...]


# --------------------------------------------------------------------------- #
# host-side glue
# --------------------------------------------------------------------------- #
def build_gcn_adjacency(edge_index, num_nodes):
    """Dense GCN-normalized adjacency: D^-1/2 (A + I) D^-1/2 (reference path).
    NOTE: duplicate edges / pre-existing self-loops are double-counted (matches
    the in-file reference)."""
    src = edge_index[0]
    dst = edge_index[1]
    a = jnp.zeros((num_nodes, num_nodes), jnp.float32).at[dst, src].add(1.0)
    a = a + jnp.eye(num_nodes, dtype=jnp.float32)
    deg = a.sum(axis=1)
    dinv = jnp.where(deg > 0.0, 1.0 / jnp.sqrt(deg), 0.0)
    return a * dinv[:, None] * dinv[None, :]


def _build_gcn_adjacency_padded(edge_index, num_nodes, n_pad, dtype):
    """Build A_hat directly at padded size in the aggregation dtype.

    Avoids holding an extra f32 n_pad^2 copy: the normalize + cast fuses into
    one XLA expression over the single f32 count matrix.  Padded rows/cols have
    zero degree -> dinv 0 -> stay exactly zero.  For Reddit-scale graphs this
    dense O(N^2) build must be replaced by a sparse/blocked aggregation."""
    src = edge_index[0]
    dst = edge_index[1]
    counts = jnp.zeros((n_pad, n_pad), jnp.float32).at[dst, src].add(1.0)
    self_loop = (jnp.arange(n_pad) < num_nodes).astype(jnp.float32)
    counts = counts + jnp.diag(self_loop)
    deg = counts.sum(axis=1)
    dinv = jnp.where(deg > 0.0, 1.0 / jnp.sqrt(deg), 0.0)
    return (counts * dinv[:, None] * dinv[None, :]).astype(dtype)


def _pack_params(w1_eff, params):
    """Pack every weight/bias (zero-padded to 128 lanes) into one f32 buffer.

    Correctness of the 128-lane padding relies on every padded column/row being
    exactly zero (tanh(0)=0, relu(0)=0) — asserted here so a future non-zero
    init cannot silently corrupt lanes feeding later matmuls."""
    buf = jnp.zeros((P_ROWS, PAD), jnp.float32)   # zero padding by construction

    def put(b, row, w, rows_avail):
        w = jnp.asarray(w, jnp.float32)
        assert w.ndim == 2, "packed params must be 2-D"
        assert w.shape[0] <= rows_avail and w.shape[1] <= PAD, (
            f"param of shape {w.shape} does not fit its slot "
            f"({rows_avail} rows x {PAD} lanes)")
        return b.at[row:row + w.shape[0], :w.shape[1]].set(w)

    buf = put(buf, ROW_W1, w1_eff, 128)
    buf = put(buf, ROW_W2, params["W2"], 128)
    buf = put(buf, ROW_WG1, params["Wg1"], 128)
    buf = put(buf, ROW_WG2, params["Wg2"], 128)
    buf = put(buf, ROW_WP1, params["Wp1"], 128)
    buf = put(buf, ROW_WP2, params["Wp2"], 128)
    buf = put(buf, ROW_B1, params["b1"], 8)
    buf = put(buf, ROW_B2, params["b2"], 8)
    buf = put(buf, ROW_BG1, params["bg1"], 8)
    buf = put(buf, ROW_BG2, params["bg2"], 8)
    buf = put(buf, ROW_BP1, params["bp1"], 8)
    buf = put(buf, ROW_BP2, params["bp2"], 8)
    return buf


def reddit_skip_forward(x, edge_index, priors, reddit_activity, params, *,
                        row_tile=256, k_tile=2048, embed_row_tile=1024,
                        use_bf16=True, vmem_limit_bytes=48 * 1024 * 1024):
    """Forward pass.

    Per-generation tuning (VMEM per tile is bounded independent of N now):
      v7x : row_tile=256,  k_tile=8192,  vmem_limit_bytes <= ~48 MiB
      v6e : row_tile=512,  k_tile=16384, vmem_limit_bytes ~= 96 MiB
      v5e : same as v6e
    Defaults fit every generation with large headroom.
    """
    n = x.shape[0]
    n_sub = reddit_activity.shape[1]
    k_in = NODE_FEATURES + n_sub
    assert k_in <= PAD, "node+subreddit feature width must fit in 128 lanes"

    def rup(a, b):
        return pl.cdiv(a, b) * b

    # tile hygiene: rows multiple of 8 (sublane), A's K-block multiple of 128 (lane)
    row_tile = rup(max(int(row_tile), 8), 8)
    k_tile = rup(max(int(k_tile), 128), 128)
    embed_row_tile = rup(max(int(embed_row_tile), 8), 8)

    n_pad = rup(n, row_tile)
    k_tile = min(k_tile, n_pad)          # == n_pad -> full-dim block (always legal)
    if k_tile < n_pad:
        lcm = row_tile * k_tile // math.gcd(row_tile, k_tile)
        n_pad = rup(n_pad, lcm)          # both row_tile and k_tile divide n_pad

    # pass-1 tile: largest divisor of n_pad that is <= embed_row_tile (mult of 8)
    embed_tile = row_tile
    cand = min(embed_row_tile, n_pad)
    while cand >= 8:
        if n_pad % cand == 0:
            embed_tile = cand
            break
        cand -= 8

    agg_dtype = jnp.bfloat16 if use_bf16 else jnp.float32

    # --- dense GCN-normalized adjacency, built padded & in agg dtype directly ---
    a_pad = _build_gcn_adjacency_padded(edge_index, n, n_pad, agg_dtype)

    # --- fold the subreddit aggregation into the first linear layer ---
    w1x = params["W1"][:NODE_FEATURES, :]
    w1s = params["W1"][NODE_FEATURES:, :]
    w1_eff = jnp.concatenate([w1x, params["R"] @ w1s], axis=0)      # [k_in, H_EMBED]
    x_eff = jnp.concatenate([x, reddit_activity], axis=1)           # [n, k_in]
    x_pad = jnp.zeros((n_pad, PAD), jnp.float32).at[:n, :k_in].set(x_eff)

    priors_pad = jnp.zeros((n_pad, 1), jnp.float32).at[:n, :].set(priors)

    p_buf = _pack_params(w1_eff, params)                            # [816, 128] f32

    cparams_rows = pltpu.CompilerParams(
        dimension_semantics=("parallel",),
        vmem_limit_bytes=vmem_limit_bytes,
    )
    cparams_agg = pltpu.CompilerParams(
        dimension_semantics=("parallel", "arbitrary"),
        vmem_limit_bytes=vmem_limit_bytes,
    )

    # ------------------------- pass 1: MLP_embed + h @ Wg1 -------------------- #
    p0 = pl.pallas_call(
        _embed_kernel,
        out_shape=jax.ShapeDtypeStruct((n_pad, PAD), agg_dtype),
        grid=(n_pad // embed_tile,),
        in_specs=[pl.BlockSpec((embed_tile, PAD), lambda i: (i, 0)),
                  pl.BlockSpec((P_ROWS, PAD), lambda i: (0, 0))],
        out_specs=pl.BlockSpec((embed_tile, PAD), lambda i: (i, 0)),
        compiler_params=cparams_rows,
    )(x_pad, p_buf)

    # ---------------- passes 2/3: K-tiled aggregations (rows x k grid) -------- #
    grid_agg = (n_pad // row_tile, n_pad // k_tile)
    a_spec = pl.BlockSpec((row_tile, k_tile), lambda i, k: (i, k))
    feat_spec = pl.BlockSpec((k_tile, PAD), lambda i, k: (k, 0))
    par_spec = pl.BlockSpec((P_ROWS, PAD), lambda i, k: (0, 0))
    out_row_spec = pl.BlockSpec((row_tile, PAD), lambda i, k: (i, 0))

    # pass 2: relu(A @ p0 + bg1) @ Wg2  -> p1
    p1 = pl.pallas_call(
        _gcn1_kernel,
        out_shape=jax.ShapeDtypeStruct((n_pad, PAD), agg_dtype),
        grid=grid_agg,
        in_specs=[a_spec, feat_spec, par_spec],
        out_specs=out_row_spec,
        scratch_shapes=[pltpu.VMEM((row_tile, PAD), jnp.float32)],
        compiler_params=cparams_agg,
    )(a_pad, p0, p_buf)

    # pass 3: relu(A @ p1 + bg2) -> MLP_pred -> + priors (lane-dense 128-wide slab)
    out = pl.pallas_call(
        _gcn2_pred_kernel,
        out_shape=jax.ShapeDtypeStruct((n_pad, PAD), jnp.float32),
        grid=grid_agg,
        in_specs=[a_spec, feat_spec,
                  pl.BlockSpec((row_tile, 1), lambda i, k: (i, 0)),
                  par_spec],
        out_specs=out_row_spec,
        scratch_shapes=[pltpu.VMEM((row_tile, PAD), jnp.float32)],
        compiler_params=cparams_agg,
    )(a_pad, p1, priors_pad, p_buf)

    return out[:n, :OUT_DIM]


def reddit_skip_reference(x, edge_index, priors, reddit_activity, params):
    """Pure-JAX reference with identical math, for correctness checking."""
    a_hat = build_gcn_adjacency(edge_index, x.shape[0])
    sub_agg = reddit_activity @ params["R"]
    h = jnp.concatenate([x, sub_agg], axis=1)
    h = jnp.tanh(h @ params["W1"] + params["b1"])
    h = jnp.tanh(h @ params["W2"] + params["b2"])
    h = jnp.maximum(a_hat @ (h @ params["Wg1"]) + params["bg1"], 0.0)
    h = jnp.maximum(a_hat @ (h @ params["Wg2"]) + params["bg2"], 0.0)
    h = jnp.tanh(h @ params["Wp1"] + params["bp1"])
    out = jnp.tanh(h @ params["Wp2"] + params["bp2"])
    return out + priors


def init_params(key, num_subreddits):
    ks = jax.random.split(key, 16)
    u = lambda k, shape, s=0.2: jax.random.uniform(k, shape, jnp.float32, -s, s)
    d_in = NODE_FEATURES + SUB_REP_DIM
    return {
        "R":   jax.random.uniform(ks[0], (num_subreddits, SUB_REP_DIM), jnp.float32),
        "W1":  u(ks[1], (d_in, H_EMBED)),   "b1":  u(ks[2], (1, H_EMBED)),
        "W2":  u(ks[3], (H_EMBED, D_GCN)),  "b2":  u(ks[4], (1, D_GCN)),
        "Wg1": u(ks[5], (D_GCN, D_GCN)),    "bg1": u(ks[6], (1, D_GCN)),
        "Wg2": u(ks[7], (D_GCN, D_GCN)),    "bg2": u(ks[8], (1, D_GCN)),
        "Wp1": u(ks[9], (D_GCN, H_PRED)),   "bp1": u(ks[10], (1, H_PRED)),
        "Wp2": u(ks[11], (H_PRED, OUT_DIM)),"bp2": u(ks[12], (1, OUT_DIM)),
    }


if __name__ == "__main__":
    key = jax.random.PRNGKey(0)

    # ---------- test 1: tiny graph, single-tile grids ----------
    N_NODES = 16
    NUM_SUBREDDITS = 8
    N_EDGES = 40
    k_x, k_s, k_e, k_p, k_w = jax.random.split(key, 5)
    x = jax.random.normal(k_x, (N_NODES, NODE_FEATURES), jnp.float32)
    reddit_activity = jax.random.uniform(k_s, (N_NODES, NUM_SUBREDDITS), jnp.float32)
    edge_index = jax.random.randint(k_e, (2, N_EDGES), 0, N_NODES, jnp.int32)
    priors = jax.random.normal(k_p, (N_NODES, OUT_DIM), jnp.float32)
    params = init_params(k_w, NUM_SUBREDDITS)

    ref = reddit_skip_reference(x, edge_index, priors, reddit_activity, params)

    out_f32 = reddit_skip_forward(x, edge_index, priors, reddit_activity, params,
                                  use_bf16=False)
    jax.block_until_ready(out_f32)
    assert out_f32.shape == (N_NODES, OUT_DIM)
    assert jnp.allclose(out_f32, ref, atol=1e-4, rtol=1e-4)

    out = reddit_skip_forward(x, edge_index, priors, reddit_activity, params)
    jax.block_until_ready(out)
    assert out.shape == (N_NODES, OUT_DIM)
    assert jnp.allclose(out, ref, atol=2e-2, rtol=0)

    # ---------- test 2: larger graph, exercises multi-row / multi-K tiling ----------
    N2, E2 = 300, 900
    k_x2, k_s2, k_e2, k_p2 = jax.random.split(jax.random.PRNGKey(1), 4)
    x2 = jax.random.normal(k_x2, (N2, NODE_FEATURES), jnp.float32)
    s2 = jax.random.uniform(k_s2, (N2, NUM_SUBREDDITS), jnp.float32)
    e2 = jax.random.randint(k_e2, (2, E2), 0, N2, jnp.int32)
    pr2 = jax.random.normal(k_p2, (N2, OUT_DIM), jnp.float32)

    ref2 = reddit_skip_reference(x2, e2, pr2, s2, params)

    out2_f32 = reddit_skip_forward(x2, e2, pr2, s2, params,
                                   row_tile=64, k_tile=128, embed_row_tile=128,
                                   use_bf16=False)
    jax.block_until_ready(out2_f32)
    assert out2_f32.shape == (N2, OUT_DIM)
    assert jnp.allclose(out2_f32, ref2, atol=1e-4, rtol=1e-4)

    out2 = reddit_skip_forward(x2, e2, pr2, s2, params,
                               row_tile=64, k_tile=128, embed_row_tile=128)
    jax.block_until_ready(out2)
    assert out2.shape == (N2, OUT_DIM)
    assert jnp.allclose(out2, ref2, atol=5e-2, rtol=0)

    print("KERNEL_OK")
</pallas_src>

<mosaic_0001>
module attributes {stable_mosaic.version = 11 : i64} {
  func.func @_embed_kernel(%arg0: i32, %arg1: memref<256x128xf32, #tpu.memory_space<vmem>>, %arg2: memref<816x128xf32, #tpu.memory_space<vmem>>, %arg3: memref<256x128xf32, #tpu.memory_space<vmem>>) attributes {dimension_semantics = [#tpu.dimension_semantics<parallel>], iteration_bounds = array<i64: 1>, scalar_prefetch = 0 : i64, scratch_operands = 0 : i64, tpu.core_type = #tpu.core_type<tc>, window_params = [{transform_indices = @transform_0, window_bounds = array<i64: 256, 128>}, {pipeline_mode = #tpu.pipeline_mode<synchronous>, transform_indices = @transform_1, window_bounds = array<i64: 816, 128>}, {transform_indices = @transform_2, window_bounds = array<i64: 256, 128>}]} {
    %c0 = arith.constant 0 : index
    %c0_0 = arith.constant 0 : index
    %0 = vector.load %arg2[%c0, %c0_0] : memref<816x128xf32, #tpu.memory_space<vmem>>, vector<128x128xf32>
    %c128 = arith.constant 128 : index
    %c0_1 = arith.constant 0 : index
    %1 = vector.load %arg2[%c128, %c0_1] : memref<816x128xf32, #tpu.memory_space<vmem>>, vector<128x128xf32>
    %c256 = arith.constant 256 : index
    %c0_2 = arith.constant 0 : index
    %2 = vector.load %arg2[%c256, %c0_2] : memref<816x128xf32, #tpu.memory_space<vmem>>, vector<128x128xf32>
    %c768 = arith.constant 768 : index
    %c0_3 = arith.constant 0 : index
    %3 = vector.load %arg2[%c768, %c0_3] : memref<816x128xf32, #tpu.memory_space<vmem>>, vector<1x128xf32>
    %c776 = arith.constant 776 : index
    %c0_4 = arith.constant 0 : index
    %4 = vector.load %arg2[%c776, %c0_4] : memref<816x128xf32, #tpu.memory_space<vmem>>, vector<1x128xf32>
    %c0_5 = arith.constant 0 : index
    %c0_6 = arith.constant 0 : index
    %5 = vector.load %arg1[%c0_5, %c0_6] : memref<256x128xf32, #tpu.memory_space<vmem>>, vector<256x128xf32>
    %cst = arith.constant dense<0.000000e+00> : vector<256x128xf32>
    %6 = tpu.matmul %5, %0, %cst {dimension_numbers = #tpu.dot_dimension_numbers<[1], [0], [0], [1], [0, 0, 1, 1], [], []>} : vector<256x128xf32>, vector<128x128xf32>, vector<256x128xf32> -> vector<256x128xf32>
    %7 = vector.broadcast %3 : vector<1x128xf32> to vector<256x128xf32>
    %8 = arith.addf %6, %7 : vector<256x128xf32>
    %9 = math.tanh %8 : vector<256x128xf32>
    %cst_7 = arith.constant dense<0.000000e+00> : vector<256x128xf32>
    %10 = tpu.matmul %9, %1, %cst_7 {dimension_numbers = #tpu.dot_dimension_numbers<[1], [0], [0], [1], [0, 0, 1, 1], [], []>} : vector<256x128xf32>, vector<128x128xf32>, vector<256x128xf32> -> vector<256x128xf32>
    %11 = vector.broadcast %4 : vector<1x128xf32> to vector<256x128xf32>
    %12 = arith.addf %10, %11 : vector<256x128xf32>
    %13 = math.tanh %12 : vector<256x128xf32>
    %cst_8 = arith.constant dense<0.000000e+00> : vector<256x128xf32>
    %14 = tpu.matmul %13, %2, %cst_8 {dimension_numbers = #tpu.dot_dimension_numbers<[1], [0], [0], [1], [0, 0, 1, 1], [], []>} : vector<256x128xf32>, vector<128x128xf32>, vector<256x128xf32> -> vector<256x128xf32>
    %c0_9 = arith.constant 0 : index
    %c0_10 = arith.constant 0 : index
    %15 = vector.load %arg3[%c0_9, %c0_10] : memref<256x128xf32, #tpu.memory_space<vmem>>, vector<256x128xf32>
    tpu.vector_store %arg3[%c0_9, %c0_10], %14 {strides = array<i32>} : memref<256x128xf32, #tpu.memory_space<vmem>>, vector<256x128xf32>,
    return
  }
  func.func @transform_0(%arg0: i32) -> (i32, i32) {
    %c0_i32 = arith.constant 0 : i32
    %c0_i32_0 = arith.constant 0 : i32
    return %arg0, %c0_i32 : i32, i32
  }
  func.func @transform_1(%arg0: i32) -> (i32, i32) {
    %c0_i32 = arith.constant 0 : i32
    %c0_i32_0 = arith.constant 0 : i32
    %c0_i32_1 = arith.constant 0 : i32
    return %c0_i32, %c0_i32_0 : i32, i32
  }
  func.func @transform_2(%arg0: i32) -> (i32, i32) {
    %c0_i32 = arith.constant 0 : i32
    %c0_i32_0 = arith.constant 0 : i32
    return %arg0, %c0_i32 : i32, i32
  }
}

</mosaic_0001>

<bundles_post_ra>
// kernel: tpu_custom_call.1
= control target key start
LH: loop header
LB: loop body
LE: loop exit
PB: predicated region body
PF: predicated region fallthrough
CT: control target
= control target key end

     0   :  { %7 = vsyncpa [#allocation3], 0  ;;  %s1797_s0 = inlined_call_operand.hbm [shape: f32[256,128], index: 0, kind: input, shape index: {}]   ;;  %s1798_s1 = inlined_call_operand.hbm [shape: f32[816,128], index: 1, kind: input, shape index: {}]   ;;  %s1799_s2 = inlined_call_operand.hbm [shape: f32[256,128], index: 2, kind: output, shape index: {}]  }
   0x1   :  { %8 = vsyncpa [#allocation6], 0 }
   0x2   :  { %9 = vsyncpa [#allocation4], 0  ;;  %s1622_s9 = smov [#allocation2]   ;;  %s1550_s13 = scalar_lea.hbm %s1797_s0, 4096 }
   0x3   :  { %s15_s10 = sshll.u32 %s1622_s9, 4  ;;  %p1551_p0 = scmp.ne.s32.totalorder %s1797_s0, %s1550_s13  ;;  %s16_s10 = int_to_ptr.vmem [resolvable:$true] %s15_s10 }
   0x4   :  { %p1554_p1 = scmp.lt.u32.totalorder %s1550_s13, %s1797_s0 }
   0x6   :  { %p1556_p2 = pnand %p1554_p1, %p1551_p0 }
   0x8   :  { %1559 = shalt.err (!%p1556_p2)
}
   0x9   :  { %s1560_s18 = scalar_lea.vmem %s16_s10, 4096  ;;  %p1565_p4 = scmp.lt.s32.totalorder %s16_s10, %s16_s10 }
   0xa   :  { %p1561_p3 = scmp.ne.s32.totalorder %s16_s10, %s1560_s18  ;;  %p1566_p5 = scmp.lt.s32.totalorder %s1560_s18, %s1560_s18 }
   0xc   :  { %p1567_p6 = por %p1566_p5, %p1565_p4 }
   0xe   :  { %p1568_p7 = pnand %p1567_p6, %p1561_p3 }
  0x10   :  { %1571 = shalt.err (!%p1568_p7)
}
  0x11   :  { %s1623_s19 = smov 128   ;;  %s1624_s20 = smov 8  }
  0x12   :  { %21 = dma.hbm_to_vmem [thread:$0]  %s1797_s0, 4096, %s16_s10, [#allocation3], %s1623_s19, %s1623_s19, %s1624_s20  }
  0x13   :  { %s1625_s23 = smov [#allocation5]   ;;  %s1572_s27 = scalar_lea.hbm %s1798_s1, 13056 }
  0x14   :  { %s27_s24 = sshll.u32 %s1625_s23, 4  ;;  %p1573_p8 = scmp.ne.s32.totalorder %s1798_s1, %s1572_s27  ;;  %s28_s24 = int_to_ptr.vmem [resolvable:$true] %s27_s24 }
  0x15   :  { %p1576_p9 = scmp.lt.u32.totalorder %s1572_s27, %s1798_s1 }
  0x17   :  { %p1578_p10 = pnand %p1576_p9, %p1573_p8 }
  0x19   :  { %1581 = shalt.err (!%p1578_p10)
}
  0x1a   :  { %s1582_s4 = scalar_lea.vmem %s28_s24, 13056  ;;  %p1587_p12 = scmp.lt.s32.totalorder %s28_s24, %s28_s24 }
  0x1b   :  { %p1583_p11 = scmp.ne.s32.totalorder %s28_s24, %s1582_s4  ;;  %p1588_p13 = scmp.lt.s32.totalorder %s1582_s4, %s1582_s4 }
  0x1d   :  { %p1589_p0 = por %p1588_p13, %p1587_p12 }
  0x1f   :  { %p1590_p1 = pnand %p1589_p0, %p1583_p11 }
  0x21   :  { %1593 = shalt.err (!%p1590_p1)
}
  0x22   :  { %33 = dma.hbm_to_vmem [thread:$0]  %s1798_s1, 13056, %s28_s24, [#allocation6], %s1623_s19, %s1623_s19, %s1624_s20  }
  0x23   :  { %1616 = dma.done.wait [#allocation3], 4096  }
  0x24   :  { %1617 = vsyncadd [#allocation3], 4294963200 }
  0x25   :  { %1618 = dma.done.wait [#allocation6], 13056  }
  0x26   :  { %1619 = vsyncadd [#allocation6], 4294954240  ;;  %v40_v0 = vld [vmem:[#allocation5] sm:$0xff]  ;;  %v41_v1 = vld [vmem:[#allocation5 + $0x8] sm:$0xff]  ;;  %s1626_s1 = smov [#allocation7]  }
  0x27   :  { %v42_v2 = vld [vmem:[#allocation5 + $0x10] sm:$0xff]  ;;  %v1305_v3 = vpack.c.bf16 %v41_v1, %v40_v0  ;;  %v43_v4 = vld [vmem:[#allocation5 + $0x18] sm:$0xff]  ;;  %v44_v6 = vld [vmem:[#allocation5 + $0x20] sm:$0xff]  ;;  %s906_s6 = sshll.u32 %s1626_s1, 4  ;;  %s907_s6 = int_to_ptr.vmem [resolvable:$true] %s906_s6 }
  0x28   :  { %v1309_v5 = vpack.c.bf16 %v43_v4, %v42_v2  ;;  %v45_v7 = vld [vmem:[#allocation5 + $0x28] sm:$0xff]  ;;  %v90_v9 = vld [vmem:[#allocation2] sm:$0xff]  ;;  %v46_v10 = vld [vmem:[#allocation5 + $0x30] sm:$0xff]  ;;  %s1594_s7 = scalar_lea.vmem %s907_s6, 4096  ;;  %p1599_p3 = scmp.lt.s32.totalorder %s907_s6, %s907_s6 }
  0x29   :  { %1306 = vmatprep.subr.bf16.mxu0 %v1305_v3  ;;  %1401 = vmatprep.subr.bf16.mxu1 %v1305_v3  ;;  %v1313_v8 = vpack.c.bf16 %v45_v7, %v44_v6  ;;  %v47_v11 = vld [vmem:[#allocation5 + $0x38] sm:$0xff]  ;;  %v48_v13 = vld [vmem:[#allocation5 + $0x40] sm:$0xff]  ;;  %v49_v14 = vld [vmem:[#allocation5 + $0x48] sm:$0xff]  ;;  %p1595_p2 = scmp.ne.s32.totalorder %s907_s6, %s1594_s7  ;;  %p1600_p4 = scmp.lt.s32.totalorder %s1594_s7, %s1594_s7 }
  0x2a   :  { %1308 = vmatpush3.bf16.msra.mxu0 %v1305_v3  ;;  %1409 = vmatpush3.bf16.msra.mxu1 %v1305_v3  ;;  %v1317_v12 = vpack.c.bf16 %v47_v11, %v46_v10  ;;  %v106_v15 = vld [vmem:[#allocation2 + $0x80] sm:$0xff]  ;;  %v1321_v16 = vpack.c.bf16 %v49_v14, %v48_v13  ;;  %v50_v17 = vld [vmem:[#allocation5 + $0x50] sm:$0xff]  ;;  %v51_v18 = vld [vmem:[#allocation5 + $0x58] sm:$0xff] }
  0x2b   :  { %1310 = vmatprep.subr.bf16.mxu0 %v1309_v5  ;;  %1402 = vmatprep.subr.bf16.mxu1 %v1309_v5  ;;  %v1325_v19 = vpack.c.bf16 %v51_v18, %v50_v17  ;;  %v52_v20 = vld [vmem:[#allocation5 + $0x60] sm:$0xff]  ;;  %v53_v21 = vld [vmem:[#allocation5 + $0x68] sm:$0xff]  ;;  %v54_v23 = vld [vmem:[#allocation5 + $0x70] sm:$0xff]  ;;  %p1601_p5 = por %p1600_p4, %p1599_p3 }
  0x2c   :  { %1097 = vmatprep.mubr.f32.mxu0 %v90_v9  ;;  %1121 = vmatprep.mubr.f32.mxu1 %v106_v15  ;;  %v1329_v22 = vpack.c.bf16 %v53_v21, %v52_v20  ;;  %v55_v24 = vld [vmem:[#allocation5 + $0x78] sm:$0xff]  ;;  %v56_v26 = vld [vmem:[#allocation5 + $0x80] sm:$0xff]  ;;  %v57_v27 = vld [vmem:[#allocation5 + $0x88] sm:$0xff] }
  0x2d   :  { %v1333_v25 = vpack.c.bf16 %v55_v24, %v54_v23  ;;  %v1337_v28 = vpack.c.bf16 %v57_v27, %v56_v26  ;;  %v58_v29 = vld [vmem:[#allocation5 + $0x90] sm:$0xff]  ;;  %v59_v30 = vld [vmem:[#allocation5 + $0x98] sm:$0xff]  ;;  %v91_v31 = vld [vmem:[#allocation2 + $0x8] sm:$0xff]  ;;  %p1602_p6 = pnand %p1601_p5, %p1595_p2 }
  0x2e   :  { %1312 = vmatpush3.bf16.msra.mxu0 %v1309_v5  ;;  %1410 = vmatpush3.bf16.msra.mxu1 %v1309_v5  ;;  %v107_v32 = vld [vmem:[#allocation2 + $0x88] sm:$0xff]  ;;  %v92_v33 = vld [vmem:[#allocation2 + $0x10] sm:$0xff]  ;;  %v1341_v35 = vpack.c.bf16 %v59_v30, %v58_v29  ;;  %v60_v36 = vld [vmem:[#allocation5 + $0xa0] sm:$0xff] }
  0x2f   :  { %1314 = vmatprep.subr.bf16.mxu0 %v1313_v8  ;;  %1403 = vmatprep.subr.bf16.mxu1 %v1313_v8  ;;  %v108_v34 = vld [vmem:[#allocation2 + $0x90] sm:$0xff]  ;;  %v61_v37 = vld [vmem:[#allocation5 + $0xa8] sm:$0xff]  ;;  %v93_v38 = vld [vmem:[#allocation2 + $0x18] sm:$0xff] }
  0x30   :  { %v109_v39 = vld [vmem:[#allocation2 + $0x98] sm:$0xff]  ;;  %v94_v40 = vld [vmem:[#allocation2 + $0x20] sm:$0xff]  ;;  %v1345_v42 = vpack.c.bf16 %v61_v37, %v60_v36  ;;  %v62_v43 = vld [vmem:[#allocation5 + $0xb0] sm:$0xff] }
  0x31   :  { %v110_v41 = vld [vmem:[#allocation2 + $0xa0] sm:$0xff]  ;;  %v63_v44 = vld [vmem:[#allocation5 + $0xb8] sm:$0xff]  ;;  %v95_v45 = vld [vmem:[#allocation2 + $0x28] sm:$0xff] }
  0x32   :  { %1316 = vmatpush3.bf16.msra.mxu0 %v1313_v8  ;;  %1411 = vmatpush3.bf16.msra.mxu1 %v1313_v8  ;;  %v111_v46 = vld [vmem:[#allocation2 + $0xa8] sm:$0xff]  ;;  %v96_v47 = vld [vmem:[#allocation2 + $0x30] sm:$0xff]  ;;  %v1349_v49 = vpack.c.bf16 %v63_v44, %v62_v43  ;;  %v64_v50 = vld [vmem:[#allocation5 + $0xc0] sm:$0xff] }
  0x33   :  { %1318 = vmatprep.subr.bf16.mxu0 %v1317_v12  ;;  %1404 = vmatprep.subr.bf16.mxu1 %v1317_v12  ;;  %v112_v48 = vld [vmem:[#allocation2 + $0xb0] sm:$0xff]  ;;  %v65_v51 = vld [vmem:[#allocation5 + $0xc8] sm:$0xff]  ;;  %v97_v52 = vld [vmem:[#allocation2 + $0x38] sm:$0xff] }
  0x34   :  { %v113_v53 = vld [vmem:[#allocation2 + $0xb8] sm:$0xff]  ;;  %v98_v54 = vld [vmem:[#allocation2 + $0x40] sm:$0xff]  ;;  %v1353_v56 = vpack.c.bf16 %v65_v51, %v64_v50  ;;  %v99_v57 = vld [vmem:[#allocation2 + $0x48] sm:$0xff] }
  0x35   :  { %v114_v55 = vld [vmem:[#allocation2 + $0xc0] sm:$0xff]  ;;  %v115_v58 = vld [vmem:[#allocation2 + $0xc8] sm:$0xff]  ;;  %v100_v59 = vld [vmem:[#allocation2 + $0x50] sm:$0xff] }
  0x36   :  { %1320 = vmatpush3.bf16.msra.mxu0 %v1317_v12  ;;  %1412 = vmatpush3.bf16.msra.mxu1 %v1317_v12  ;;  %v116_v60 = vld [vmem:[#allocation2 + $0xd0] sm:$0xff]  ;;  %v101_v61 = vld [vmem:[#allocation2 + $0x58] sm:$0xff]  ;;  %v102_v63 = vld [vmem:[#allocation2 + $0x60] sm:$0xff] }
  0x37   :  { %1322 = vmatprep.subr.bf16.mxu0 %v1321_v16  ;;  %1405 = vmatprep.subr.bf16.mxu1 %v1321_v16  ;;  %v117_v62 = vld [vmem:[#allocation2 + $0xd8] sm:$0xff]  ;;  %v118_v0 = vld [vmem:[#allocation2 + $0xe0] sm:$0xff]  ;;  %v103_v1 = vld [vmem:[#allocation2 + $0x68] sm:$0xff] }
  0x38   :  { %v119_v2 = vld [vmem:[#allocation2 + $0xe8] sm:$0xff]  ;;  %v104_v3 = vld [vmem:[#allocation2 + $0x70] sm:$0xff]  ;;  %v105_v5 = vld [vmem:[#allocation2 + $0x78] sm:$0xff] }
  0x39   :  { %v120_v4 = vld [vmem:[#allocation2 + $0xf0] sm:$0xff]  ;;  %v121_v6 = vld [vmem:[#allocation2 + $0xf8] sm:$0xff]  ;;  %v68_v10 = vld [vmem:[#allocation5 + $0xe0] sm:$0xff] }
  0x3a   :  { %1324 = vmatpush3.bf16.msra.mxu0 %v1321_v16  ;;  %1413 = vmatpush3.bf16.msra.mxu1 %v1321_v16  ;;  %v66_v7 = vld [vmem:[#allocation5 + $0xd0] sm:$0xff]  ;;  %v67_v8 = vld [vmem:[#allocation5 + $0xd8] sm:$0xff]  ;;  %v69_v11 = vld [vmem:[#allocation5 + $0xe8] sm:$0xff] }
  0x3b   :  { %1326 = vmatprep.subr.bf16.mxu0 %v1325_v19  ;;  %1406 = vmatprep.subr.bf16.mxu1 %v1325_v19  ;;  %v1357_v9 = vpack.c.bf16 %v67_v8, %v66_v7  ;;  %v1361_v12 = vpack.c.bf16 %v69_v11, %v68_v10  ;;  %v70_v13 = vld [vmem:[#allocation5 + $0xf0] sm:$0xff]  ;;  %v71_v14 = vld [vmem:[#allocation5 + $0xf8] sm:$0xff]  ;;  %v72_v16 = vld [vmem:[#allocation5 + $0x100] sm:$0xff] }
  0x3c   :  { %v1365_v15 = vpack.c.bf16 %v71_v14, %v70_v13  ;;  %v73_v17 = vld [vmem:[#allocation5 + $0x108] sm:$0xff]  ;;  %v74_v18 = vld [vmem:[#allocation5 + $0x110] sm:$0xff]  ;;  %v75_v20 = vld [vmem:[#allocation5 + $0x118] sm:$0xff] }
  0x3d   :  { %v1373_v21 = vpack.c.bf16 %v75_v20, %v74_v18  ;;  %v77_v23 = vld [vmem:[#allocation5 + $0x128] sm:$0xff]  ;;  %v79_v26 = vld [vmem:[#allocation5 + $0x138] sm:$0xff] }
  0x3e   :  { %1328 = vmatpush3.bf16.msra.mxu0 %v1325_v19  ;;  %1414 = vmatpush3.bf16.msra.mxu1 %v1325_v19  ;;  %v1369_v19 = vpack.c.bf16 %v73_v17, %v72_v16  ;;  %v81_v29 = vld [vmem:[#allocation5 + $0x148] sm:$0xff] }
  0x3f   :  { %1330 = vmatprep.subr.bf16.mxu0 %v1329_v22  ;;  %1407 = vmatprep.subr.bf16.mxu1 %v1329_v22 }
  0x42   :  { %1332 = vmatpush3.bf16.msra.mxu0 %v1329_v22  ;;  %1415 = vmatpush3.bf16.msra.mxu1 %v1329_v22  ;;  %v76_v22 = vld [vmem:[#allocation5 + $0x120] sm:$0xff] }
  0x43   :  { %1334 = vmatprep.subr.bf16.mxu0 %v1333_v25  ;;  %1408 = vmatprep.subr.bf16.mxu1 %v1333_v25  ;;  %v1377_v24 = vpack.c.bf16 %v77_v23, %v76_v22 }
  0x46   :  { %1336 = vmatpush3.bf16.msra.mxu0 %v1333_v25  ;;  %1416 = vmatpush3.bf16.msra.mxu1 %v1333_v25  ;;  %v78_v25 = vld [vmem:[#allocation5 + $0x130] sm:$0xff] }
  0x47   :  { %1338 = vmatprep.subr.bf16.mxu1 %v1337_v28  ;;  %1370 = vmatprep.subr.bf16.mxu0 %v1369_v19  ;;  %v1381_v27 = vpack.c.bf16 %v79_v26, %v78_v25 }
  0x49   :  { %1098 = vmatmul.mubr.f32.vlgmr.msra.gmra.mrb[0].mxu0 %v91_v31  ;;  %1122 = vmatmul.mubr.f32.vlgmr.msra.gmra.mrb[0].mxu1 %v107_v32  ;;  %v1672_v31 = vld [vmem:[#allocation5 + $0x300] ss:$0 sm:$0xff] }
  0x4a   :  { %1100 = vmatprep.mubr.f32.mxu0 %v92_v33  ;;  %1124 = vmatprep.mubr.f32.mxu1 %v108_v34 }
  0x4b   :  { %1340 = vmatpush3.bf16.msra.mxu1 %v1337_v28  ;;  %1372 = vmatpush3.bf16.msra.mxu0 %v1369_v19  ;;  %v80_v28 = vld [vmem:[#allocation5 + $0x140] sm:$0xff] }
  0x4c   :  { %1342 = vmatprep.subr.bf16.mxu1 %v1341_v35  ;;  %1374 = vmatprep.subr.bf16.mxu0 %v1373_v21  ;;  %v1385_v30 = vpack.c.bf16 %v81_v29, %v80_v28 }
  0x4d   :  { %1101 = vmatmul.mubr.f32.gmra.mrb[2].mxu0 %v93_v38  ;;  %1125 = vmatmul.mubr.f32.gmra.mrb[2].mxu1 %v109_v39 }
  0x4e   :  { %1103 = vmatprep.mubr.f32.mxu0 %v94_v40  ;;  %1127 = vmatprep.mubr.f32.mxu1 %v110_v41 }
  0x4f   :  { %1344 = vmatpush3.bf16.msra.mxu1 %v1341_v35  ;;  %1376 = vmatpush3.bf16.msra.mxu0 %v1373_v21 }
  0x50   :  { %1346 = vmatprep.subr.bf16.mxu1 %v1345_v42  ;;  %1378 = vmatprep.subr.bf16.mxu0 %v1377_v24 }
  0x51   :  { %1104 = vmatmul.mubr.f32.gmra.mrb[4].mxu0 %v95_v45  ;;  %1128 = vmatmul.mubr.f32.gmra.mrb[4].mxu1 %v111_v46 }
  0x52   :  { %1106 = vmatprep.mubr.f32.mxu0 %v96_v47  ;;  %1130 = vmatprep.mubr.f32.mxu1 %v112_v48 }
  0x53   :  { %1348 = vmatpush3.bf16.msra.mxu1 %v1345_v42  ;;  %1380 = vmatpush3.bf16.msra.mxu0 %v1377_v24 }
  0x54   :  { %1350 = vmatprep.subr.bf16.mxu1 %v1349_v49  ;;  %1382 = vmatprep.subr.bf16.mxu0 %v1381_v27 }
  0x55   :  { %1107 = vmatmul.mubr.f32.gmra.mrb[6].mxu0 %v97_v52  ;;  %1131 = vmatmul.mubr.f32.gmra.mrb[6].mxu1 %v113_v53 }
  0x56   :  { %1109 = vmatprep.mubr.f32.mxu0 %v98_v54  ;;  %1133 = vmatprep.mubr.f32.mxu1 %v114_v55 }
  0x57   :  { %1352 = vmatpush3.bf16.msra.mxu1 %v1349_v49  ;;  %1384 = vmatpush3.bf16.msra.mxu0 %v1381_v27 }
  0x58   :  { %1354 = vmatprep.subr.bf16.mxu1 %v1353_v56  ;;  %1386 = vmatprep.subr.bf16.mxu0 %v1385_v30 }
  0x59   :  { %1110 = vmatmul.mubr.f32.gmra.mrb[8].mxu0 %v99_v57  ;;  %1134 = vmatmul.mubr.f32.gmra.mrb[8].mxu1 %v115_v58 }
  0x5a   :  { %1112 = vmatprep.mubr.f32.mxu0 %v100_v59  ;;  %1136 = vmatprep.mubr.f32.mxu1 %v116_v60 }
  0x5b   :  { %1356 = vmatpush3.bf16.msra.mxu1 %v1353_v56  ;;  %1388 = vmatpush3.bf16.msra.mxu0 %v1385_v30 }
  0x5c   :  { %1358 = vmatprep.subr.bf16.mxu1 %v1357_v9 }
  0x5d   :  { %1113 = vmatmul.mubr.f32.gmra.mrb[10].mxu0 %v101_v61  ;;  %1137 = vmatmul.mubr.f32.gmra.mrb[10].mxu1 %v117_v62 }
  0x5e   :  { %1115 = vmatprep.mubr.f32.mxu0 %v102_v63  ;;  %1139 = vmatprep.mubr.f32.mxu1 %v118_v0 }
  0x5f   :  { %1360 = vmatpush3.bf16.msra.mxu1 %v1357_v9 }
  0x60   :  { %1362 = vmatprep.subr.bf16.mxu1 %v1361_v12 }
  0x61   :  { %1116 = vmatmul.mubr.f32.gmra.mrb[12].mxu0 %v103_v1  ;;  %1140 = vmatmul.mubr.f32.gmra.mrb[12].mxu1 %v119_v2 }
  0x62   :  { %1118 = vmatprep.mubr.f32.mxu0 %v104_v3  ;;  %1142 = vmatprep.mubr.f32.mxu1 %v120_v4 }
  0x63   :  { %1364 = vmatpush3.bf16.msra.mxu1 %v1361_v12 }
  0x64   :  { %1366 = vmatprep.subr.bf16.mxu1 %v1365_v15 }
  0x65   :  { %1119 = vmatmul.mubr.f32.gmra.mrb[14].mxu0 %v105_v5  ;;  %1143 = vmatmul.mubr.f32.gmra.mrb[14].mxu1 %v121_v6 }
  0x67   :  { %1368 = vmatpush3.bf16.msra.mxu1 %v1365_v15 }
 0x11c   :  { %v1099_v32 = vpop.f32.mrb[0].mxu0  ;;  %v1674_v33 = vpop.f32.mrb[0].mxu1 }
 0x11d   :  { %v198_v34 = vadd.f32 %v1099_v32, %v1672_v31  ;;  %v192_v35 = vpop.f32.mrb[1].mxu0  ;;  %v1677_v36 = vpop.f32.mrb[1].mxu1  ;;  %v278_v28 = vadd.f32 %v1674_v33, %v1672_v31 }
 0x11e   :  { %v193_v37 = vadd.f32 %v1672_v31, %v192_v35  ;;  %v273_v18 = vadd.f32 %v1672_v31, %v1677_v36 }
 0x120   :  { %1422 = vtanh.f32 %v193_v37  ;;  %v1102_v38 = vpop.f32.mrb[2].mxu0  ;;  %v1680_v39 = vpop.f32.mrb[2].mxu1 }
 0x121   :  { %1424 = vtanh.f32 %v198_v34  ;;  %v208_v40 = vadd.f32 %v1102_v38, %v1672_v31  ;;  %v202_v41 = vpop.f32.mrb[3].mxu0  ;;  %v1683_v42 = vpop.f32.mrb[3].mxu1  ;;  %v288_v34 = vadd.f32 %v1680_v39, %v1672_v31 }
 0x122   :  { %v203_v43 = vadd.f32 %v1672_v31, %v202_v41  ;;  %v283_v27 = vadd.f32 %v1672_v31, %v1683_v42 }
 0x124   :  { %1426 = vtanh.f32 %v203_v43  ;;  %v1105_v44 = vpop.f32.mrb[4].mxu0  ;;  %v1686_v45 = vpop.f32.mrb[4].mxu1 }
 0x125   :  { %1428 = vtanh.f32 %v208_v40  ;;  %v218_v46 = vadd.f32 %v1105_v44, %v1672_v31  ;;  %v212_v47 = vpop.f32.mrb[5].mxu0  ;;  %v1689_v48 = vpop.f32.mrb[5].mxu1  ;;  %v298_v38 = vadd.f32 %v1686_v45, %v1672_v31 }
 0x126   :  { %v213_v49 = vadd.f32 %v1672_v31, %v212_v47  ;;  %v293_v32 = vadd.f32 %v1672_v31, %v1689_v48 }
 0x128   :  { %1430 = vtanh.f32 %v213_v49  ;;  %v1108_v50 = vpop.f32.mrb[6].mxu0  ;;  %v1692_v51 = vpop.f32.mrb[6].mxu1 }
 0x129   :  { %1432 = vtanh.f32 %v218_v46  ;;  %v228_v52 = vadd.f32 %v1108_v50, %v1672_v31  ;;  %v222_v53 = vpop.f32.mrb[7].mxu0  ;;  %v1695_v54 = vpop.f32.mrb[7].mxu1  ;;  %v308_v42 = vadd.f32 %v1692_v51, %v1672_v31 }
 0x12a   :  { %v1423_v55 = vpop.eup %1422  ;;  %v223_v56 = vadd.f32 %v1672_v31, %v222_v53  ;;  %v303_v33 = vadd.f32 %v1672_v31, %v1695_v54 }
 0x12b   :  { %v1425_v57 = vpop.eup %1424  ;;  %1177 = vmatprep.mubr.f32.mxu1 %v1423_v55 }
 0x12c   :  { %1434 = vtanh.f32 %v223_v56  ;;  %v1111_v58 = vpop.f32.mrb[8].mxu0  ;;  %1178 = vmatmul.mubr.f32.vlgmr.msra.gmra.mrb[16].mxu1 %v1425_v57  ;;  %v1698_v59 = vpop.f32.mrb[8].mxu1 }
 0x12d   :  { %1436 = vtanh.f32 %v228_v52  ;;  %v238_v60 = vadd.f32 %v1111_v58, %v1672_v31  ;;  %v232_v61 = vpop.f32.mrb[9].mxu0  ;;  %v1701_v62 = vpop.f32.mrb[9].mxu1  ;;  %v318_v46 = vadd.f32 %v1698_v59, %v1672_v31 }
 0x12e   :  { %v1427_v63 = vpop.eup %1426  ;;  %v233_v0 = vadd.f32 %v1672_v31, %v232_v61  ;;  %v313_v39 = vadd.f32 %v1672_v31, %v1701_v62 }
 0x12f   :  { %v1429_v1 = vpop.eup %1428  ;;  %1180 = vmatprep.mubr.f32.mxu1 %v1427_v63 }
 0x130   :  { %1438 = vtanh.f32 %v233_v0  ;;  %v1114_v2 = vpop.f32.mrb[10].mxu0  ;;  %1181 = vmatmul.mubr.f32.gmra.mrb[18].mxu1 %v1429_v1  ;;  %v1704_v3 = vpop.f32.mrb[10].mxu1  ;;  %v82_v1 = vld [vmem:[#allocation5 + $0x150] sm:$0xff] }
 0x131   :  { %1440 = vtanh.f32 %v238_v60  ;;  %v248_v4 = vadd.f32 %v1114_v2, %v1672_v31  ;;  %v242_v5 = vpop.f32.mrb[11].mxu0  ;;  %v1707_v6 = vpop.f32.mrb[11].mxu1  ;;  %v328_v50 = vadd.f32 %v1704_v3, %v1672_v31  ;;  %v83_v2 = vld [vmem:[#allocation5 + $0x158] sm:$0xff] }
 0x132   :  { %v1431_v7 = vpop.eup %1430  ;;  %v243_v8 = vadd.f32 %v1672_v31, %v242_v5  ;;  %v323_v45 = vadd.f32 %v1672_v31, %v1707_v6  ;;  %v1389_v3 = vpack.c.bf16 %v83_v2, %v82_v1  ;;  %v86_v6 = vld [vmem:[#allocation5 + $0x170] sm:$0xff] }
 0x133   :  { %v1433_v9 = vpop.eup %1432  ;;  %1183 = vmatprep.mubr.f32.mxu1 %v1431_v7  ;;  %v87_v7 = vld [vmem:[#allocation5 + $0x178] sm:$0xff] }
 0x134   :  { %1442 = vtanh.f32 %v243_v8  ;;  %v1117_v10 = vpop.f32.mrb[12].mxu0  ;;  %1184 = vmatmul.mubr.f32.gmra.mrb[20].mxu1 %v1433_v9  ;;  %v1710_v11 = vpop.f32.mrb[12].mxu1  ;;  %1390 = vmatprep.subr.bf16.mxu0 %v1389_v3  ;;  %v1397_v8 = vpack.c.bf16 %v87_v7, %v86_v6  ;;  %v1748_v9 = vld [vmem:[#allocation5 + $0x308] ss:$0 sm:$0xff] }
 0x135   :  { %1444 = vtanh.f32 %v248_v4  ;;  %v258_v12 = vadd.f32 %v1117_v10, %v1672_v31  ;;  %v252_v13 = vpop.f32.mrb[13].mxu0  ;;  %v332_v14 = vpop.f32.mrb[13].mxu1  ;;  %v338_v54 = vadd.f32 %v1710_v11, %v1672_v31  ;;  %1392 = vmatpush3.bf16.msra.mxu0 %v1389_v3  ;;  %v85_v4 = vld [vmem:[#allocation5 + $0x168] sm:$0xff] }
 0x136   :  { %v1435_v15 = vpop.eup %1434  ;;  %v253_v16 = vadd.f32 %v1672_v31, %v252_v13  ;;  %v333_v49 = vadd.f32 %v1672_v31, %v332_v14 }
 0x137   :  { %v1437_v17 = vpop.eup %1436  ;;  %1186 = vmatprep.mubr.f32.mxu1 %v1435_v15 }
 0x138   :  { %1446 = vtanh.f32 %v253_v16  ;;  %v1120_v19 = vpop.f32.mrb[14].mxu0  ;;  %1187 = vmatmul.mubr.f32.gmra.mrb[22].mxu1 %v1437_v17  ;;  %v1716_v20 = vpop.f32.mrb[14].mxu1 }
 0x139   :  { %1448 = vtanh.f32 %v258_v12  ;;  %v268_v21 = vadd.f32 %v1120_v19, %v1672_v31  ;;  %v262_v22 = vpop.f32.mrb[15].mxu0  ;;  %v342_v23 = vpop.f32.mrb[15].mxu1  ;;  %v348_v57 = vadd.f32 %v1716_v20, %v1672_v31 }
 0x13a   :  { %v1439_v24 = vpop.eup %1438  ;;  %v263_v25 = vadd.f32 %v1672_v31, %v262_v22  ;;  %1450 = vtanh.f32 %v273_v18  ;;  %v343_v53 = vadd.f32 %v1672_v31, %v342_v23  ;;  %v84_v31 = vld [vmem:[#allocation5 + $0x160] sm:$0xff] }
 0x13b   :  { %v1441_v26 = vpop.eup %1440  ;;  %1189 = vmatprep.mubr.f32.mxu1 %v1439_v24  ;;  %v1393_v5 = vpack.c.bf16 %v85_v4, %v84_v31 }
 0x13c   :  { %1452 = vtanh.f32 %v263_v25  ;;  %1190 = vmatmul.mubr.f32.gmra.mrb[24].mxu1 %v1441_v26 }
 0x13d   :  { %1454 = vtanh.f32 %v268_v21  ;;  %1394 = vmatprep.subr.bf16.mxu0 %v1393_v5 }
 0x13e   :  { %v1443_v29 = vpop.eup %1442  ;;  %1456 = vtanh.f32 %v283_v27  ;;  %1396 = vmatpush3.bf16.msra.mxu0 %v1393_v5 }
 0x13f   :  { %v1445_v30 = vpop.eup %1444  ;;  %1192 = vmatprep.mubr.f32.mxu1 %v1443_v29  ;;  %1458 = vtanh.f32 %v278_v28  ;;  %1398 = vmatprep.subr.bf16.mxu0 %v1397_v8 }
 0x140   :  { %1193 = vmatmul.mubr.f32.gmra.mrb[26].mxu1 %v1445_v30  ;;  %1460 = vtanh.f32 %v293_v32 }
 0x141   :  { %1462 = vtanh.f32 %v288_v34 }
 0x142   :  { %v1447_v35 = vpop.eup %1446  ;;  %1464 = vtanh.f32 %v303_v33  ;;  %1400 = vmatpush3.bf16.msra.mxu0 %v1397_v8 }
 0x143   :  { %v1449_v36 = vpop.eup %1448  ;;  %1195 = vmatprep.mubr.f32.mxu1 %v1447_v35  ;;  %1466 = vtanh.f32 %v298_v38 }
 0x144   :  { %1196 = vmatmul.mubr.f32.gmra.mrb[28].mxu1 %v1449_v36  ;;  %v1451_v37 = vpop.eup %1450  ;;  %1468 = vtanh.f32 %v313_v39 }
 0x145   :  { %1470 = vtanh.f32 %v308_v42 }
 0x146   :  { %v1453_v40 = vpop.eup %1452  ;;  %1472 = vtanh.f32 %v323_v45 }
 0x147   :  { %v1455_v41 = vpop.eup %1454  ;;  %1198 = vmatprep.mubr.f32.mxu1 %v1453_v40  ;;  %1474 = vtanh.f32 %v318_v46 }
 0x148   :  { %1199 = vmatmul.mubr.f32.gmra.mrb[30].mxu1 %v1455_v41  ;;  %v1457_v43 = vpop.eup %1456  ;;  %1476 = vtanh.f32 %v333_v49 }
 0x149   :  { %1201 = vmatprep.mubr.f32.mxu1 %v1451_v37  ;;  %v1459_v44 = vpop.eup %1458  ;;  %1478 = vtanh.f32 %v328_v50 }
 0x14a   :  { %v1461_v47 = vpop.eup %1460  ;;  %1480 = vtanh.f32 %v343_v53 }
 0x14b   :  { %v1463_v48 = vpop.eup %1462  ;;  %1482 = vtanh.f32 %v338_v54 }
 0x14c   :  { %1202 = vmatmul.mubr.f32.gmra.mrb[32].mxu1 %v1459_v44  ;;  %v1465_v51 = vpop.eup %1464  ;;  %1484 = vtanh.f32 %v348_v57 }
 0x14d   :  { %1204 = vmatprep.mubr.f32.mxu1 %v1457_v43  ;;  %v1467_v52 = vpop.eup %1466 }
 0x14e   :  { %v1469_v55 = vpop.eup %1468 }
 0x14f   :  { %v1471_v56 = vpop.eup %1470 }
 0x150   :  { %1205 = vmatmul.mubr.f32.gmra.mrb[34].mxu1 %v1463_v48  ;;  %v1473_v58 = vpop.eup %1472 }
 0x151   :  { %1207 = vmatprep.mubr.f32.mxu1 %v1461_v47  ;;  %v1475_v59 = vpop.eup %1474 }
 0x152   :  { %v1477_v60 = vpop.eup %1476 }
 0x153   :  { %v1479_v61 = vpop.eup %1478 }
 0x154   :  { %1208 = vmatmul.mubr.f32.gmra.mrb[36].mxu1 %v1467_v52  ;;  %v1481_v62 = vpop.eup %1480 }
 0x155   :  { %1210 = vmatprep.mubr.f32.mxu1 %v1465_v51  ;;  %v1483_v63 = vpop.eup %1482 }
 0x156   :  { %v1485_v0 = vpop.eup %1484 }
 0x158   :  { %1211 = vmatmul.mubr.f32.gmra.mrb[38].mxu1 %v1471_v56 }
 0x159   :  { %1213 = vmatprep.mubr.f32.mxu1 %v1469_v55 }
 0x15c   :  { %1214 = vmatmul.mubr.f32.gmra.mrb[40].mxu1 %v1475_v59 }
 0x15d   :  { %1216 = vmatprep.mubr.f32.mxu1 %v1473_v58 }
 0x160   :  { %1217 = vmatmul.mubr.f32.gmra.mrb[42].mxu1 %v1479_v61 }
 0x161   :  { %1219 = vmatprep.mubr.f32.mxu1 %v1477_v60 }
 0x164   :  { %1220 = vmatmul.mubr.f32.gmra.mrb[44].mxu1 %v1483_v63 }
 0x165   :  { %1222 = vmatprep.mubr.f32.mxu1 %v1481_v62 }
 0x168   :  { %1223 = vmatmul.mubr.f32.gmra.mrb[46].mxu1 %v1485_v0 }
 0x1ff   :  { %v1179_v10 = vpop.f32.mrb[16].mxu1 }
 0x200   :  { %v459_v11 = vadd.f32 %v1179_v10, %v1748_v9  ;;  %v453_v12 = vpop.f32.mrb[17].mxu1 }
 0x201   :  { %v454_v13 = vadd.f32 %v1748_v9, %v453_v12 }
 0x203   :  { %1486 = vtanh.f32 %v454_v13  ;;  %v1182_v14 = vpop.f32.mrb[18].mxu1 }
 0x204   :  { %1488 = vtanh.f32 %v459_v11  ;;  %v469_v15 = vadd.f32 %v1182_v14, %v1748_v9  ;;  %v463_v16 = vpop.f32.mrb[19].mxu1 }
 0x205   :  { %v464_v17 = vadd.f32 %v1748_v9, %v463_v16 }
 0x207   :  { %1490 = vtanh.f32 %v464_v17  ;;  %v1185_v18 = vpop.f32.mrb[20].mxu1 }
 0x208   :  { %1492 = vtanh.f32 %v469_v15  ;;  %v479_v19 = vadd.f32 %v1185_v18, %v1748_v9  ;;  %v473_v20 = vpop.f32.mrb[21].mxu1 }
 0x209   :  { %v474_v21 = vadd.f32 %v1748_v9, %v473_v20 }
 0x20b   :  { %1494 = vtanh.f32 %v474_v21  ;;  %v1188_v22 = vpop.f32.mrb[22].mxu1 }
 0x20c   :  { %1496 = vtanh.f32 %v479_v19  ;;  %v489_v23 = vadd.f32 %v1188_v22, %v1748_v9  ;;  %v483_v24 = vpop.f32.mrb[23].mxu1 }
 0x20d   :  { %v1487_v25 = vpop.eup %1486  ;;  %v484_v26 = vadd.f32 %v1748_v9, %v483_v24 }
 0x20e   :  { %v1489_v27 = vpop.eup %1488  ;;  %1257 = vmatprep.mubr.f32.mxu0 %v1487_v25 }
 0x20f   :  { %1498 = vtanh.f32 %v484_v26  ;;  %v1191_v28 = vpop.f32.mrb[24].mxu1  ;;  %1258 = vmatmul.mubr.f32.vlgmr.msra.gmra.mrb[16].mxu0 %v1489_v27 }
 0x210   :  { %1500 = vtanh.f32 %v489_v23  ;;  %v499_v29 = vadd.f32 %v1191_v28, %v1748_v9  ;;  %v493_v30 = vpop.f32.mrb[25].mxu1 }
 0x211   :  { %v1491_v32 = vpop.eup %1490  ;;  %v494_v34 = vadd.f32 %v1748_v9, %v493_v30 }
 0x212   :  { %v1493_v35 = vpop.eup %1492  ;;  %1260 = vmatprep.mubr.f32.mxu0 %v1491_v32 }
 0x213   :  { %1502 = vtanh.f32 %v494_v34  ;;  %v1194_v36 = vpop.f32.mrb[26].mxu1  ;;  %1261 = vmatmul.mubr.f32.gmra.mrb[18].mxu0 %v1493_v35 }
 0x214   :  { %1504 = vtanh.f32 %v499_v29  ;;  %v509_v33 = vadd.f32 %v1194_v36, %v1748_v9  ;;  %v503_v37 = vpop.f32.mrb[27].mxu1 }
 0x215   :  { %v1495_v38 = vpop.eup %1494  ;;  %v504_v40 = vadd.f32 %v1748_v9, %v503_v37 }
 0x216   :  { %v1497_v41 = vpop.eup %1496  ;;  %1263 = vmatprep.mubr.f32.mxu0 %v1495_v38 }
 0x217   :  { %1506 = vtanh.f32 %v504_v40  ;;  %v1197_v39 = vpop.f32.mrb[28].mxu1  ;;  %1264 = vmatmul.mubr.f32.gmra.mrb[20].mxu0 %v1497_v41 }
 0x218   :  { %1508 = vtanh.f32 %v509_v33  ;;  %v519_v42 = vadd.f32 %v1197_v39, %v1748_v9  ;;  %v513_v43 = vpop.f32.mrb[29].mxu1 }
 0x219   :  { %v1499_v44 = vpop.eup %1498  ;;  %v514_v45 = vadd.f32 %v1748_v9, %v513_v43 }
 0x21a   :  { %v1501_v46 = vpop.eup %1500  ;;  %1266 = vmatprep.mubr.f32.mxu0 %v1499_v44 }
 0x21b   :  { %1510 = vtanh.f32 %v514_v45  ;;  %v1200_v47 = vpop.f32.mrb[30].mxu1  ;;  %1267 = vmatmul.mubr.f32.gmra.mrb[22].mxu0 %v1501_v46 }
 0x21c   :  { %1512 = vtanh.f32 %v519_v42  ;;  %v529_v48 = vadd.f32 %v1200_v47, %v1748_v9  ;;  %v523_v49 = vpop.f32.mrb[31].mxu1 }
 0x21d   :  { %v1503_v50 = vpop.eup %1502  ;;  %v524_v51 = vadd.f32 %v1748_v9, %v523_v49 }
 0x21e   :  { %v1505_v52 = vpop.eup %1504  ;;  %1269 = vmatprep.mubr.f32.mxu0 %v1503_v50 }
 0x21f   :  { %1514 = vtanh.f32 %v524_v51  ;;  %v1203_v53 = vpop.f32.mrb[32].mxu1  ;;  %1270 = vmatmul.mubr.f32.gmra.mrb[24].mxu0 %v1505_v52 }
 0x220   :  { %1516 = vtanh.f32 %v529_v48  ;;  %v539_v54 = vadd.f32 %v1203_v53, %v1748_v9  ;;  %v533_v55 = vpop.f32.mrb[33].mxu1 }
 0x221   :  { %v1507_v56 = vpop.eup %1506  ;;  %v534_v57 = vadd.f32 %v1748_v9, %v533_v55 }
 0x222   :  { %v1509_v58 = vpop.eup %1508  ;;  %1272 = vmatprep.mubr.f32.mxu0 %v1507_v56 }
 0x223   :  { %1518 = vtanh.f32 %v534_v57  ;;  %v1206_v59 = vpop.f32.mrb[34].mxu1  ;;  %1273 = vmatmul.mubr.f32.gmra.mrb[26].mxu0 %v1509_v58 }
 0x224   :  { %1520 = vtanh.f32 %v539_v54  ;;  %v549_v60 = vadd.f32 %v1206_v59, %v1748_v9  ;;  %v543_v61 = vpop.f32.mrb[35].mxu1 }
 0x225   :  { %v1511_v62 = vpop.eup %1510  ;;  %v544_v63 = vadd.f32 %v1748_v9, %v543_v61 }
 0x226   :  { %v1513_v0 = vpop.eup %1512  ;;  %1275 = vmatprep.mubr.f32.mxu0 %v1511_v62 }
 0x227   :  { %1522 = vtanh.f32 %v544_v63  ;;  %v1209_v1 = vpop.f32.mrb[36].mxu1  ;;  %1276 = vmatmul.mubr.f32.gmra.mrb[28].mxu0 %v1513_v0 }
 0x228   :  { %1524 = vtanh.f32 %v549_v60  ;;  %v559_v2 = vadd.f32 %v1209_v1, %v1748_v9  ;;  %v553_v3 = vpop.f32.mrb[37].mxu1 }
 0x229   :  { %v1515_v31 = vpop.eup %1514  ;;  %v554_v4 = vadd.f32 %v1748_v9, %v553_v3 }
 0x22a   :  { %v1517_v5 = vpop.eup %1516  ;;  %1278 = vmatprep.mubr.f32.mxu0 %v1515_v31 }
 0x22b   :  { %1526 = vtanh.f32 %v554_v4  ;;  %v1212_v6 = vpop.f32.mrb[38].mxu1  ;;  %1279 = vmatmul.mubr.f32.gmra.mrb[30].mxu0 %v1517_v5 }
 0x22c   :  { %1528 = vtanh.f32 %v559_v2  ;;  %v569_v7 = vadd.f32 %v1212_v6, %v1748_v9  ;;  %v563_v8 = vpop.f32.mrb[39].mxu1 }
 0x22d   :  { %v1519_v10 = vpop.eup %1518  ;;  %v564_v11 = vadd.f32 %v1748_v9, %v563_v8 }
 0x22e   :  { %v1521_v12 = vpop.eup %1520  ;;  %1281 = vmatprep.mubr.f32.mxu0 %v1519_v10 }
 0x22f   :  { %1530 = vtanh.f32 %v564_v11  ;;  %v1215_v13 = vpop.f32.mrb[40].mxu1  ;;  %1282 = vmatmul.mubr.f32.gmra.mrb[32].mxu0 %v1521_v12 }
 0x230   :  { %1532 = vtanh.f32 %v569_v7  ;;  %v579_v14 = vadd.f32 %v1215_v13, %v1748_v9  ;;  %v573_v15 = vpop.f32.mrb[41].mxu1 }
 0x231   :  { %v1523_v16 = vpop.eup %1522  ;;  %v574_v17 = vadd.f32 %v1748_v9, %v573_v15 }
 0x232   :  { %v1525_v18 = vpop.eup %1524  ;;  %1284 = vmatprep.mubr.f32.mxu0 %v1523_v16 }
 0x233   :  { %1534 = vtanh.f32 %v574_v17  ;;  %v1218_v19 = vpop.f32.mrb[42].mxu1  ;;  %1285 = vmatmul.mubr.f32.gmra.mrb[34].mxu0 %v1525_v18 }
 0x234   :  { %1536 = vtanh.f32 %v579_v14  ;;  %v589_v20 = vadd.f32 %v1218_v19, %v1748_v9  ;;  %v583_v21 = vpop.f32.mrb[43].mxu1 }
 0x235   :  { %v1527_v22 = vpop.eup %1526  ;;  %v584_v23 = vadd.f32 %v1748_v9, %v583_v21 }
 0x236   :  { %v1529_v24 = vpop.eup %1528  ;;  %1287 = vmatprep.mubr.f32.mxu0 %v1527_v22 }
 0x237   :  { %1538 = vtanh.f32 %v584_v23  ;;  %v1221_v25 = vpop.f32.mrb[44].mxu1  ;;  %1288 = vmatmul.mubr.f32.gmra.mrb[36].mxu0 %v1529_v24 }
 0x238   :  { %1540 = vtanh.f32 %v589_v20  ;;  %v599_v26 = vadd.f32 %v1221_v25, %v1748_v9  ;;  %v593_v27 = vpop.f32.mrb[45].mxu1 }
 0x239   :  { %v1531_v28 = vpop.eup %1530  ;;  %v594_v29 = vadd.f32 %v1748_v9, %v593_v27 }
 0x23a   :  { %v1533_v30 = vpop.eup %1532  ;;  %1290 = vmatprep.mubr.f32.mxu0 %v1531_v28 }
 0x23b   :  { %1542 = vtanh.f32 %v594_v29  ;;  %v1224_v32 = vpop.f32.mrb[46].mxu1  ;;  %1291 = vmatmul.mubr.f32.gmra.mrb[38].mxu0 %v1533_v30 }
 0x23c   :  { %1544 = vtanh.f32 %v599_v26  ;;  %v609_v34 = vadd.f32 %v1224_v32, %v1748_v9  ;;  %v603_v35 = vpop.f32.mrb[47].mxu1 }
 0x23d   :  { %v1535_v36 = vpop.eup %1534  ;;  %v604_v33 = vadd.f32 %v1748_v9, %v603_v35 }
 0x23e   :  { %v1537_v37 = vpop.eup %1536  ;;  %1293 = vmatprep.mubr.f32.mxu0 %v1535_v36 }
 0x23f   :  { %1546 = vtanh.f32 %v604_v33  ;;  %1294 = vmatmul.mubr.f32.gmra.mrb[40].mxu0 %v1537_v37 }
 0x240   :  { %1548 = vtanh.f32 %v609_v34 }
 0x241   :  { %v1539_v38 = vpop.eup %1538 }
 0x242   :  { %v1541_v40 = vpop.eup %1540  ;;  %1296 = vmatprep.mubr.f32.mxu0 %v1539_v38 }
 0x243   :  { %1297 = vmatmul.mubr.f32.gmra.mrb[42].mxu0 %v1541_v40 }
 0x245   :  { %v1543_v41 = vpop.eup %1542 }
 0x246   :  { %v1545_v39 = vpop.eup %1544  ;;  %1299 = vmatprep.mubr.f32.mxu0 %v1543_v41 }
 0x247   :  { %1300 = vmatmul.mubr.f32.gmra.mrb[44].mxu0 %v1545_v39 }
 0x249   :  { %v1547_v42 = vpop.eup %1546 }
 0x24a   :  { %v1549_v43 = vpop.eup %1548  ;;  %1302 = vmatprep.mubr.f32.mxu0 %v1547_v42 }
 0x24b   :  { %1303 = vmatmul.mubr.f32.gmra.mrb[46].mxu0 %v1549_v43 }
 0x2e2   :  { %v1259_v44 = vpop.f32.mrb[16].mxu0 }
 0x2e3   :  { %870 = vst [vmem:[#allocation7 + $0x8] sm:$0xff] %v1259_v44  ;;  %v710_v9 = vpop.f32.mrb[17].mxu0 }
 0x2e4   :  { %869 = vst [vmem:[#allocation7] sm:$0xff] %v710_v9 }
 0x2e6   :  { %v1262_v45 = vpop.f32.mrb[18].mxu0 }
 0x2e7   :  { %872 = vst [vmem:[#allocation7 + $0x18] sm:$0xff] %v1262_v45  ;;  %v720_v46 = vpop.f32.mrb[19].mxu0 }
 0x2e8   :  { %871 = vst [vmem:[#allocation7 + $0x10] sm:$0xff] %v720_v46 }
 0x2ea   :  { %v1265_v47 = vpop.f32.mrb[20].mxu0 }
 0x2eb   :  { %874 = vst [vmem:[#allocation7 + $0x28] sm:$0xff] %v1265_v47  ;;  %v730_v48 = vpop.f32.mrb[21].mxu0 }
 0x2ec   :  { %873 = vst [vmem:[#allocation7 + $0x20] sm:$0xff] %v730_v48 }
 0x2ee   :  { %v1268_v49 = vpop.f32.mrb[22].mxu0 }
 0x2ef   :  { %876 = vst [vmem:[#allocation7 + $0x38] sm:$0xff] %v1268_v49  ;;  %v740_v50 = vpop.f32.mrb[23].mxu0 }
 0x2f0   :  { %875 = vst [vmem:[#allocation7 + $0x30] sm:$0xff] %v740_v50 }
 0x2f2   :  { %v1271_v51 = vpop.f32.mrb[24].mxu0 }
 0x2f3   :  { %878 = vst [vmem:[#allocation7 + $0x48] sm:$0xff] %v1271_v51  ;;  %v750_v52 = vpop.f32.mrb[25].mxu0 }
 0x2f4   :  { %877 = vst [vmem:[#allocation7 + $0x40] sm:$0xff] %v750_v52 }
 0x2f6   :  { %v1274_v53 = vpop.f32.mrb[26].mxu0 }
 0x2f7   :  { %880 = vst [vmem:[#allocation7 + $0x58] sm:$0xff] %v1274_v53  ;;  %v760_v54 = vpop.f32.mrb[27].mxu0 }
 0x2f8   :  { %879 = vst [vmem:[#allocation7 + $0x50] sm:$0xff] %v760_v54 }
 0x2fa   :  { %v1277_v55 = vpop.f32.mrb[28].mxu0 }
 0x2fb   :  { %882 = vst [vmem:[#allocation7 + $0x68] sm:$0xff] %v1277_v55  ;;  %v770_v56 = vpop.f32.mrb[29].mxu0 }
 0x2fc   :  { %881 = vst [vmem:[#allocation7 + $0x60] sm:$0xff] %v770_v56 }
 0x2fe   :  { %v1280_v57 = vpop.f32.mrb[30].mxu0 }
 0x2ff   :  { %884 = vst [vmem:[#allocation7 + $0x78] sm:$0xff] %v1280_v57  ;;  %v780_v58 = vpop.f32.mrb[31].mxu0 }
 0x300   :  { %883 = vst [vmem:[#allocation7 + $0x70] sm:$0xff] %v780_v58 }
 0x302   :  { %v1283_v59 = vpop.f32.mrb[32].mxu0 }
 0x303   :  { %886 = vst [vmem:[#allocation7 + $0x88] sm:$0xff] %v1283_v59  ;;  %v790_v60 = vpop.f32.mrb[33].mxu0 }
 0x304   :  { %885 = vst [vmem:[#allocation7 + $0x80] sm:$0xff] %v790_v60 }
 0x306   :  { %v1286_v61 = vpop.f32.mrb[34].mxu0 }
 0x307   :  { %888 = vst [vmem:[#allocation7 + $0x98] sm:$0xff] %v1286_v61  ;;  %v800_v62 = vpop.f32.mrb[35].mxu0 }
 0x308   :  { %887 = vst [vmem:[#allocation7 + $0x90] sm:$0xff] %v800_v62 }
 0x30a   :  { %v1289_v63 = vpop.f32.mrb[36].mxu0 }
 0x30b   :  { %890 = vst [vmem:[#allocation7 + $0xa8] sm:$0xff] %v1289_v63  ;;  %v810_v0 = vpop.f32.mrb[37].mxu0 }
 0x30c   :  { %889 = vst [vmem:[#allocation7 + $0xa0] sm:$0xff] %v810_v0 }
 0x30e   :  { %v1292_v1 = vpop.f32.mrb[38].mxu0 }
 0x30f   :  { %892 = vst [vmem:[#allocation7 + $0xb8] sm:$0xff] %v1292_v1  ;;  %v820_v2 = vpop.f32.mrb[39].mxu0 }
 0x310   :  { %891 = vst [vmem:[#allocation7 + $0xb0] sm:$0xff] %v820_v2 }
 0x312   :  { %v1295_v3 = vpop.f32.mrb[40].mxu0 }
 0x313   :  { %894 = vst [vmem:[#allocation7 + $0xc8] sm:$0xff] %v1295_v3  ;;  %v830_v31 = vpop.f32.mrb[41].mxu0 }
 0x314   :  { %893 = vst [vmem:[#allocation7 + $0xc0] sm:$0xff] %v830_v31 }
 0x316   :  { %v1298_v4 = vpop.f32.mrb[42].mxu0 }
 0x317   :  { %896 = vst [vmem:[#allocation7 + $0xd8] sm:$0xff] %v1298_v4  ;;  %v840_v5 = vpop.f32.mrb[43].mxu0 }
 0x318   :  { %895 = vst [vmem:[#allocation7 + $0xd0] sm:$0xff] %v840_v5 }
 0x31a   :  { %v1301_v6 = vpop.f32.mrb[44].mxu0 }
 0x31b   :  { %898 = vst [vmem:[#allocation7 + $0xe8] sm:$0xff] %v1301_v6  ;;  %v850_v7 = vpop.f32.mrb[45].mxu0 }
 0x31c   :  { %897 = vst [vmem:[#allocation7 + $0xe0] sm:$0xff] %v850_v7 }
 0x31e   :  { %v1304_v8 = vpop.f32.mrb[46].mxu0 }
 0x31f   :  { %900 = vst [vmem:[#allocation7 + $0xf8] sm:$0xff] %v1304_v8  ;;  %v860_v10 = vpop.f32.mrb[47].mxu0 }
 0x320   :  { %899 = vst [vmem:[#allocation7 + $0xf0] sm:$0xff] %v860_v10 }
 0x321   :  { %1605 = shalt.err (!%p1602_p6)
}
 0x322   :  { %s1606_s10 = scalar_lea.hbm %s1799_s2, 4096 }
 0x323   :  { %p1607_p7 = scmp.ne.s32.totalorder %s1799_s2, %s1606_s10  ;;  %p1610_p8 = scmp.lt.u32.totalorder %s1606_s10, %s1799_s2 }
 0x325   :  { %p1612_p9 = pnand %p1610_p8, %p1607_p7 }
 0x327   :  { %1615 = shalt.err (!%p1612_p9)
}
 0x328   :  { %912 = dma.vmem_to_hbm [thread:$0]  %s907_s6, 4096, %s1799_s2, [#allocation4], %s1623_s19, %s1623_s19, %s1624_s20  }
 0x329   :  { %1620 = dma.done.wait [#allocation4], 4096  }
 0x32a   :  { %1621 = vsyncadd [#allocation4], 4294963200 }
 0x32b   :  { %916 = vsyncpa [#allocation3], 1 }
 0x32c   :  { %917 = vsyncpa [#allocation6], 1 }
 0x32d   :  { %918 = vsyncpa [#allocation4], 1 }

</bundles_post_ra>
